<compile_context>
chip_gen: v6e
topology: v6e:2x2x1
jax: 0.10.0
libtpu: 0.0.40
codegen_flags: <defaults>
</compile_context>

<pallas_src>
import jax
import jax.numpy as jnp
from jax.experimental import pallas as pl
from jax.experimental.pallas import tpu as pltpu


def mesh_conv_kernel(x_ref, idx_ref, w_ref, b_ref, out_ref, slab_ref):
    # x_ref:    (bt, C_in, Ep)        edge features, full (padded) edge axis resident
    # idx_ref:  (bt, 5, tE) int32     1-based gather indices in [0, E]; 0 == missing / pad
    # w_ref:    (C_out, 5*C_in)       fused conv weight: w[o, k*C_in + c] = conv.w[o, c, 0, k]
    # b_ref:    (C_out, 1)            conv bias column (broadcasts over lanes)
    # out_ref:  (bt, C_out, tE)
    # slab_ref: (5*C_in, tE) f32      VMEM scratch for the symmetric-feature slab
    bt, c_in, ep = x_ref.shape
    te = idx_ref.shape[2]

    # 1-based row iota: row r of the selection matrix is edge r, i.e. index value r+1.
    # Built once per grid step and reused across the batch tile.
    iota1 = jax.lax.broadcasted_iota(jnp.int32, (ep, 5 * te), 0) + 1
    w = w_ref[...].astype(jnp.float32)                      # (C_out, 5*C_in), tiny
    bias = b_ref[...]                                       # (C_out, 1)

    for bb in range(bt):                                    # static unroll over batch tile
        x = x_ref[bb]                                       # (C_in, Ep)
        idx = idx_ref[bb]                                    # (5, tE)

        # Flatten the 5 neighbor rows onto lanes (tiny (1, 5*tE) concat), then ONE compare +
        # ONE cast builds the fused one-hot; 0-valued (missing / padded) indices match no row.
        idx_flat = jnp.concatenate([idx[n:n + 1, :] for n in range(5)], axis=1)  # (1, 5*tE)
        sel = (iota1 == idx_flat).astype(x.dtype)            # (Ep, 5*tE)

        # Single fused gather matmul on the MXU (f32 accumulation; exact: <=1 hit per column).
        f_all = jnp.dot(x, sel, preferred_element_type=jnp.float32)   # (C_in, 5*tE)
        f0 = f_all[:, 0 * te:1 * te]
        f1 = f_all[:, 1 * te:2 * te]
        f2 = f_all[:, 2 * te:3 * te]
        f3 = f_all[:, 3 * te:4 * te]
        f4 = f_all[:, 4 * te:5 * te]

        # Order-invariant symmetric features (pure VPU), stacked along the contraction axis
        # in a VMEM scratch so the conv becomes ONE K=5*C_in matmul.
        slab_ref[0 * c_in:1 * c_in, :] = f0
        slab_ref[1 * c_in:2 * c_in, :] = f1 + f3
        slab_ref[2 * c_in:3 * c_in, :] = f2 + f4
        slab_ref[3 * c_in:4 * c_in, :] = jnp.abs(f1 - f3)
        slab_ref[4 * c_in:5 * c_in, :] = jnp.abs(f2 - f4)

        acc = jnp.dot(w, slab_ref[...], preferred_element_type=jnp.float32) + bias
        out_ref[bb] = acc.astype(out_ref.dtype)              # lane-dense store


def build_gemm(gemm_edges_list, edge_counts, num_edges):
    """Mirrors MeshConv.pad_gemm: per mesh, prepend the self edge-id column to the
    (edges_count, 4) 1-ring table and zero-pad the rows up to num_edges (padded rows
    therefore map to edge 0 after the +1 shift, exactly like the PyTorch module)."""
    gs = []
    for ge, ec in zip(gemm_edges_list, edge_counts):
        ge = jnp.asarray(ge, jnp.int32)                               # (ec, 4)
        self_col = jnp.arange(ec, dtype=jnp.int32)[:, None]           # (ec, 1)
        g = jnp.concatenate([self_col, ge], axis=1)                   # (ec, 5)
        g = jnp.pad(g, ((0, num_edges - ec), (0, 0)))                 # (E, 5)
        gs.append(g)
    return jnp.stack(gs, axis=0)                                      # (B, E, 5)


def mesh_conv(x, G, weight, bias, *, edge_tile=None, batch_tile=None):
    """x: (B, C_in, E, 1) or (B, C_in, E); G: (B, E, 5) int; weight: (C_out, C_in, 1, 5)
    (PyTorch conv2d layout); bias: (C_out,). Returns (B, C_out, E, 1) like the module."""
    if x.ndim == 4:
        x = x[..., 0]                                  # x.squeeze(-1)
    B, C_in, E = x.shape
    C_out, w_cin, _, K = weight.shape
    assert K == 5, "MeshConv symmetric functions assume k == 5"
    assert w_cin == C_in

    # Lane-dense padding of the edge axis (multiple of 128) -> unmasked vector stores.
    Ep = ((E + 127) // 128) * 128
    if Ep != E:
        x = jnp.pad(x, ((0, 0), (0, 0), (0, Ep - E)))

    # 1-based gather indices with edges on the lane axis; 0 means "missing / zero column".
    gplus = jnp.transpose(G.astype(jnp.int32) + 1, (0, 2, 1))         # (B, 5, E)
    if Ep != E:
        gplus = jnp.pad(gplus, ((0, 0), (0, 0), (0, Ep - E)))         # padded edges gather nothing

    # Tile choices.
    if edge_tile is None:
        edge_tile = Ep if Ep <= 512 else next(t for t in (512, 384, 256, 128) if Ep % t == 0)
    assert Ep % edge_tile == 0 and edge_tile % 128 == 0
    if batch_tile is None:
        batch_tile = B if B <= 4 else 1                # coarsen grid when B is small
    assert B % batch_tile == 0
    n_bt, n_et = B // batch_tile, Ep // edge_tile

    # Fused conv weight: (C_out, 5*C_in) with w2[o, k*C_in + c] = weight[o, c, 0, k].
    # Kept in the incoming dtype (bf16 stays bf16; accumulation is forced f32 in-kernel).
    wk = jnp.transpose(weight[:, :, 0, :], (0, 2, 1)).reshape(C_out, K * C_in)
    b_col = bias.reshape(C_out, 1).astype(jnp.float32)

    # Explicit VMEM budget (v5e's scoped default is only 16 MiB).
    isz = x.dtype.itemsize
    est = 2 * (batch_tile * C_in * Ep * isz            # x tiles (double-buffered)
               + batch_tile * K * edge_tile * 4        # idx tiles
               + batch_tile * C_out * edge_tile * isz  # out tiles
               + C_out * K * C_in * wk.dtype.itemsize + C_out * 4)
    est += K * C_in * edge_tile * 4                    # slab scratch
    est += Ep * K * edge_tile * (4 + isz)              # iota + one-hot temporaries
    est += C_in * K * edge_tile * 4                    # f_all
    vmem_limit = int(min(64 * 2 ** 20, max(2 * est, 16 * 2 ** 20)))

    out = pl.pallas_call(
        mesh_conv_kernel,
        out_shape=jax.ShapeDtypeStruct((B, C_out, Ep), x.dtype),
        grid=(n_bt, n_et),
        in_specs=[
            pl.BlockSpec((batch_tile, C_in, Ep), lambda bi, ti: (bi, 0, 0)),       # x (full E)
            pl.BlockSpec((batch_tile, K, edge_tile), lambda bi, ti: (bi, 0, ti)),  # indices
            pl.BlockSpec((C_out, K * C_in), lambda bi, ti: (0, 0)),                # weight
            pl.BlockSpec((C_out, 1), lambda bi, ti: (0, 0)),                       # bias
        ],
        out_specs=pl.BlockSpec((batch_tile, C_out, edge_tile), lambda bi, ti: (bi, 0, ti)),
        scratch_shapes=[pltpu.VMEM((K * C_in, edge_tile), jnp.float32)],
        compiler_params=pltpu.CompilerParams(
            dimension_semantics=("parallel", "parallel"),   # v7x: both TCs take slices
            vmem_limit_bytes=vmem_limit),
    )(x, gplus, wk, b_col)

    return out[:, :, :E, None]                          # drop lane padding, (B, C_out, E, 1)


def reference_mesh_conv(x, G, weight, bias):
    """Pure-JAX transcription of MeshConv.create_GeMM + Conv2d(1,5) for validation."""
    B, C, E = x.shape
    xpad = jnp.concatenate([jnp.zeros((B, C, 1), x.dtype), x], axis=2)   # (B, C, E+1)
    gi = G.astype(jnp.int32) + 1                                          # (B, E, 5)
    f = jax.vmap(lambda xb, gb: xb[:, gb])(xpad, gi)                      # (B, C, E, 5)
    x1 = f[..., 1] + f[..., 3]
    x2 = f[..., 2] + f[..., 4]
    x3 = jnp.abs(f[..., 1] - f[..., 3])
    x4 = jnp.abs(f[..., 2] - f[..., 4])
    g = jnp.stack([f[..., 0], x1, x2, x3, x4], axis=3)                    # (B, C, E, 5)
    out = jnp.einsum('bcek,ock->boe', g, weight[:, :, 0, :],
                     precision=jax.lax.Precision.HIGHEST) + bias[None, :, None]
    return out[..., None]                                                 # (B, C_out, E, 1)


if __name__ == "__main__":
    def run_case(case, B, C_in, C_out, E, edge_counts, **tiles):
        key = jax.random.fold_in(jax.random.PRNGKey(0), case)
        ks = jax.random.split(key, 3 + B)
        x = jax.random.normal(ks[0], (B, C_in, E, 1), dtype=jnp.float32)
        weight = 0.1 * jax.random.normal(ks[1], (C_out, C_in, 1, 5), dtype=jnp.float32)
        bias = 0.1 * jax.random.normal(ks[2], (C_out,), dtype=jnp.float32)
        # Synthetic per-mesh 1-ring tables (m.gemm_edges) with some -1 "missing" slots.
        gemm_edges_list = []
        for i, ec in enumerate(edge_counts):
            ge = jax.random.randint(ks[3 + i], (ec, 4), 0, ec, dtype=jnp.int32)
            ge = ge.at[0, 2:].set(-1)
            ge = ge.at[ec - 1, :2].set(-1)
            gemm_edges_list.append(ge)
        G = build_gemm(gemm_edges_list, edge_counts, E)                   # (B, E, 5)

        out = jax.block_until_ready(mesh_conv(x, G, weight, bias, **tiles))
        ref = reference_mesh_conv(x[..., 0], G, weight, bias)
        assert out.shape == (B, C_out, E, 1), out.shape
        err = float(jnp.max(jnp.abs(out - ref)))
        assert jnp.allclose(out, ref, atol=1e-5, rtol=1e-5), \
            f"case {case}: mismatch vs reference, max abs err {err}"

    # Case 0: batch fused into a single grid step, one edge tile (grid = (1, 1)).
    run_case(0, B=2, C_in=4, C_out=8, E=128, edge_counts=[128, 120])
    # Case 1: non-multiple-of-128 E (exercises lane padding) with explicit 2x2 grid tiling.
    run_case(1, B=2, C_in=4, C_out=8, E=200, edge_counts=[200, 180],
             batch_tile=1, edge_tile=128)

    print("KERNEL_OK")
</pallas_src>

<mosaic_0001>
module attributes {stable_mosaic.version = 11 : i64} {
  func.func @mesh_conv_kernel(%arg0: i32, %arg1: i32, %arg2: memref<2x4x128xf32, #tpu.memory_space<vmem>>, %arg3: memref<2x5x128xi32, #tpu.memory_space<vmem>>, %arg4: memref<8x20xf32, #tpu.memory_space<vmem>>, %arg5: memref<8x1xf32, #tpu.memory_space<vmem>>, %arg6: memref<2x8x128xf32, #tpu.memory_space<vmem>>, %arg7: memref<20x128xf32, #tpu.memory_space<vmem>>) attributes {dimension_semantics = [#tpu.dimension_semantics<parallel>, #tpu.dimension_semantics<parallel>], iteration_bounds = array<i64: 1, 1>, scalar_prefetch = 0 : i64, scratch_operands = 1 : i64, tpu.core_type = #tpu.core_type<tc>, window_params = [{transform_indices = @transform_0, window_bounds = array<i64: 2, 4, 128>}, {transform_indices = @transform_1, window_bounds = array<i64: 2, 5, 128>}, {pipeline_mode = #tpu.pipeline_mode<synchronous>, transform_indices = @transform_2, window_bounds = array<i64: 8, 20>}, {pipeline_mode = #tpu.pipeline_mode<synchronous>, transform_indices = @transform_3, window_bounds = array<i64: 8, 1>}, {transform_indices = @transform_4, window_bounds = array<i64: 2, 8, 128>}]} {
    %0 = tpu.iota {dimensions = array<i32: 0>} : vector<128x640xi32>
    %c1_i32 = arith.constant 1 : i32
    %1 = vector.broadcast %c1_i32 : i32 to vector<128x640xi32>
    %2 = arith.addi %0, %1 : vector<128x640xi32>
    %c0 = arith.constant 0 : index
    %c0_0 = arith.constant 0 : index
    %3 = vector.load %arg4[%c0, %c0_0] : memref<8x20xf32, #tpu.memory_space<vmem>>, vector<8x20xf32>
    %c0_1 = arith.constant 0 : index
    %c0_2 = arith.constant 0 : index
    %4 = vector.load %arg5[%c0_1, %c0_2] : memref<8x1xf32, #tpu.memory_space<vmem>>, vector<8x1xf32>
    %c0_3 = arith.constant 0 : index
    %c0_4 = arith.constant 0 : index
    %c0_5 = arith.constant 0 : index
    %5 = vector.load %arg2[%c0_3, %c0_4, %c0_5] : memref<2x4x128xf32, #tpu.memory_space<vmem>>, vector<1x4x128xf32>
    %6 = vector.shape_cast %5 : vector<1x4x128xf32> to vector<4x128xf32>
    %c0_6 = arith.constant 0 : index
    %c0_7 = arith.constant 0 : index
    %c0_8 = arith.constant 0 : index
    %7 = vector.load %arg3[%c0_6, %c0_7, %c0_8] : memref<2x5x128xi32, #tpu.memory_space<vmem>>, vector<1x5x128xi32>
    %8 = vector.shape_cast %7 : vector<1x5x128xi32> to vector<5x128xi32>
    %9 = vector.extract_strided_slice %8 {offsets = [0, 0], sizes = [1, 128], strides = [1, 1]} : vector<5x128xi32> to vector<1x128xi32>
    %10 = vector.extract_strided_slice %8 {offsets = [1, 0], sizes = [1, 128], strides = [1, 1]} : vector<5x128xi32> to vector<1x128xi32>
    %11 = vector.extract_strided_slice %8 {offsets = [2, 0], sizes = [1, 128], strides = [1, 1]} : vector<5x128xi32> to vector<1x128xi32>
    %12 = vector.extract_strided_slice %8 {offsets = [3, 0], sizes = [1, 128], strides = [1, 1]} : vector<5x128xi32> to vector<1x128xi32>
    %13 = vector.extract_strided_slice %8 {offsets = [4, 0], sizes = [1, 128], strides = [1, 1]} : vector<5x128xi32> to vector<1x128xi32>
    %14 = tpu.concatenate %9, %10, %11, %12, %13 in 1 : vector<1x128xi32>, vector<1x128xi32>, vector<1x128xi32>, vector<1x128xi32>, vector<1x128xi32> -> vector<1x640xi32>
    %15 = vector.broadcast %14 : vector<1x640xi32> to vector<128x640xi32>
    %16 = arith.cmpi eq, %2, %15 : vector<128x640xi32>
    %17 = arith.extui %16 : vector<128x640xi1> to vector<128x640xi32>
    %18 = arith.sitofp %17 : vector<128x640xi32> to vector<128x640xf32>
    %cst = arith.constant dense<0.000000e+00> : vector<4x640xf32>
    %19 = tpu.matmul %6, %18, %cst {dimension_numbers = #tpu.dot_dimension_numbers<[1], [0], [0], [1], [0, 0, 1, 1], [], []>} : vector<4x128xf32>, vector<128x640xf32>, vector<4x640xf32> -> vector<4x640xf32>
    %20 = vector.extract_strided_slice %19 {offsets = [0, 0], sizes = [4, 128], strides = [1, 1]} : vector<4x640xf32> to vector<4x128xf32>
    %21 = vector.extract_strided_slice %19 {offsets = [0, 128], sizes = [4, 128], strides = [1, 1]} : vector<4x640xf32> to vector<4x128xf32>
    %22 = vector.extract_strided_slice %19 {offsets = [0, 256], sizes = [4, 128], strides = [1, 1]} : vector<4x640xf32> to vector<4x128xf32>
    %23 = vector.extract_strided_slice %19 {offsets = [0, 384], sizes = [4, 128], strides = [1, 1]} : vector<4x640xf32> to vector<4x128xf32>
    %24 = vector.extract_strided_slice %19 {offsets = [0, 512], sizes = [4, 128], strides = [1, 1]} : vector<4x640xf32> to vector<4x128xf32>
    %c0_9 = arith.constant 0 : index
    %c0_10 = arith.constant 0 : index
    %25 = vector.load %arg7[%c0_9, %c0_10] : memref<20x128xf32, #tpu.memory_space<vmem>>, vector<4x128xf32>
    tpu.vector_store %arg7[%c0_9, %c0_10], %20 {strides = array<i32>} : memref<20x128xf32, #tpu.memory_space<vmem>>, vector<4x128xf32>,
    %26 = arith.addf %21, %23 : vector<4x128xf32>
    %c4 = arith.constant 4 : index
    %c0_11 = arith.constant 0 : index
    %27 = vector.load %arg7[%c4, %c0_11] : memref<20x128xf32, #tpu.memory_space<vmem>>, vector<4x128xf32>
    tpu.vector_store %arg7[%c4, %c0_11], %26 {strides = array<i32>} : memref<20x128xf32, #tpu.memory_space<vmem>>, vector<4x128xf32>,
    %28 = arith.addf %22, %24 : vector<4x128xf32>
    %c8 = arith.constant 8 : index
    %c0_12 = arith.constant 0 : index
    %29 = vector.load %arg7[%c8, %c0_12] : memref<20x128xf32, #tpu.memory_space<vmem>>, vector<4x128xf32>
    tpu.vector_store %arg7[%c8, %c0_12], %28 {strides = array<i32>} : memref<20x128xf32, #tpu.memory_space<vmem>>, vector<4x128xf32>,
    %30 = arith.subf %21, %23 : vector<4x128xf32>
    %31 = math.absf %30 : vector<4x128xf32>
    %c12 = arith.constant 12 : index
    %c0_13 = arith.constant 0 : index
    %32 = vector.load %arg7[%c12, %c0_13] : memref<20x128xf32, #tpu.memory_space<vmem>>, vector<4x128xf32>
    tpu.vector_store %arg7[%c12, %c0_13], %31 {strides = array<i32>} : memref<20x128xf32, #tpu.memory_space<vmem>>, vector<4x128xf32>,
    %33 = arith.subf %22, %24 : vector<4x128xf32>
    %34 = math.absf %33 : vector<4x128xf32>
    %c16 = arith.constant 16 : index
    %c0_14 = arith.constant 0 : index
    %35 = vector.load %arg7[%c16, %c0_14] : memref<20x128xf32, #tpu.memory_space<vmem>>, vector<4x128xf32>
    tpu.vector_store %arg7[%c16, %c0_14], %34 {strides = array<i32>} : memref<20x128xf32, #tpu.memory_space<vmem>>, vector<4x128xf32>,
    %c0_15 = arith.constant 0 : index
    %c0_16 = arith.constant 0 : index
    %36 = vector.load %arg7[%c0_15, %c0_16] : memref<20x128xf32, #tpu.memory_space<vmem>>, vector<20x128xf32>
    %cst_17 = arith.constant dense<0.000000e+00> : vector<8x128xf32>
    %37 = tpu.matmul %3, %36, %cst_17 {dimension_numbers = #tpu.dot_dimension_numbers<[1], [0], [0], [1], [0, 0, 1, 1], [], []>} : vector<8x20xf32>, vector<20x128xf32>, vector<8x128xf32> -> vector<8x128xf32>
    %38 = vector.broadcast %4 : vector<8x1xf32> to vector<8x128xf32>
    %39 = arith.addf %37, %38 : vector<8x128xf32>
    %c0_18 = arith.constant 0 : index
    %c0_19 = arith.constant 0 : index
    %c0_20 = arith.constant 0 : index
    %40 = vector.load %arg6[%c0_18, %c0_19, %c0_20] : memref<2x8x128xf32, #tpu.memory_space<vmem>>, vector<1x8x128xf32>
    %41 = vector.shape_cast %40 : vector<1x8x128xf32> to vector<8x128xf32>
    %42 = vector.shape_cast %39 : vector<8x128xf32> to vector<1x8x128xf32>
    tpu.vector_store %arg6[%c0_18, %c0_19, %c0_20], %42 {strides = array<i32>} : memref<2x8x128xf32, #tpu.memory_space<vmem>>, vector<1x8x128xf32>,
    %c1 = arith.constant 1 : index
    %c0_21 = arith.constant 0 : index
    %c0_22 = arith.constant 0 : index
    %43 = vector.load %arg2[%c1, %c0_21, %c0_22] : memref<2x4x128xf32, #tpu.memory_space<vmem>>, vector<1x4x128xf32>
    %44 = vector.shape_cast %43 : vector<1x4x128xf32> to vector<4x128xf32>
    %c1_23 = arith.constant 1 : index
    %c0_24 = arith.constant 0 : index
    %c0_25 = arith.constant 0 : index
    %45 = vector.load %arg3[%c1_23, %c0_24, %c0_25] : memref<2x5x128xi32, #tpu.memory_space<vmem>>, vector<1x5x128xi32>
    %46 = vector.shape_cast %45 : vector<1x5x128xi32> to vector<5x128xi32>
    %47 = vector.extract_strided_slice %46 {offsets = [0, 0], sizes = [1, 128], strides = [1, 1]} : vector<5x128xi32> to vector<1x128xi32>
    %48 = vector.extract_strided_slice %46 {offsets = [1, 0], sizes = [1, 128], strides = [1, 1]} : vector<5x128xi32> to vector<1x128xi32>
    %49 = vector.extract_strided_slice %46 {offsets = [2, 0], sizes = [1, 128], strides = [1, 1]} : vector<5x128xi32> to vector<1x128xi32>
    %50 = vector.extract_strided_slice %46 {offsets = [3, 0], sizes = [1, 128], strides = [1, 1]} : vector<5x128xi32> to vector<1x128xi32>
    %51 = vector.extract_strided_slice %46 {offsets = [4, 0], sizes = [1, 128], strides = [1, 1]} : vector<5x128xi32> to vector<1x128xi32>
    %52 = tpu.concatenate %47, %48, %49, %50, %51 in 1 : vector<1x128xi32>, vector<1x128xi32>, vector<1x128xi32>, vector<1x128xi32>, vector<1x128xi32> -> vector<1x640xi32>
    %53 = vector.broadcast %52 : vector<1x640xi32> to vector<128x640xi32>
    %54 = arith.cmpi eq, %2, %53 : vector<128x640xi32>
    %55 = arith.extui %54 : vector<128x640xi1> to vector<128x640xi32>
    %56 = arith.sitofp %55 : vector<128x640xi32> to vector<128x640xf32>
    %cst_26 = arith.constant dense<0.000000e+00> : vector<4x640xf32>
    %57 = tpu.matmul %44, %56, %cst_26 {dimension_numbers = #tpu.dot_dimension_numbers<[1], [0], [0], [1], [0, 0, 1, 1], [], []>} : vector<4x128xf32>, vector<128x640xf32>, vector<4x640xf32> -> vector<4x640xf32>
    %58 = vector.extract_strided_slice %57 {offsets = [0, 0], sizes = [4, 128], strides = [1, 1]} : vector<4x640xf32> to vector<4x128xf32>
    %59 = vector.extract_strided_slice %57 {offsets = [0, 128], sizes = [4, 128], strides = [1, 1]} : vector<4x640xf32> to vector<4x128xf32>
    %60 = vector.extract_strided_slice %57 {offsets = [0, 256], sizes = [4, 128], strides = [1, 1]} : vector<4x640xf32> to vector<4x128xf32>
    %61 = vector.extract_strided_slice %57 {offsets = [0, 384], sizes = [4, 128], strides = [1, 1]} : vector<4x640xf32> to vector<4x128xf32>
    %62 = vector.extract_strided_slice %57 {offsets = [0, 512], sizes = [4, 128], strides = [1, 1]} : vector<4x640xf32> to vector<4x128xf32>
    %c0_27 = arith.constant 0 : index
    %c0_28 = arith.constant 0 : index
    %63 = vector.load %arg7[%c0_27, %c0_28] : memref<20x128xf32, #tpu.memory_space<vmem>>, vector<4x128xf32>
    tpu.vector_store %arg7[%c0_27, %c0_28], %58 {strides = array<i32>} : memref<20x128xf32, #tpu.memory_space<vmem>>, vector<4x128xf32>,
    %64 = arith.addf %59, %61 : vector<4x128xf32>
    %c4_29 = arith.constant 4 : index
    %c0_30 = arith.constant 0 : index
    %65 = vector.load %arg7[%c4_29, %c0_30] : memref<20x128xf32, #tpu.memory_space<vmem>>, vector<4x128xf32>
    tpu.vector_store %arg7[%c4_29, %c0_30], %64 {strides = array<i32>} : memref<20x128xf32, #tpu.memory_space<vmem>>, vector<4x128xf32>,
    %66 = arith.addf %60, %62 : vector<4x128xf32>
    %c8_31 = arith.constant 8 : index
    %c0_32 = arith.constant 0 : index
    %67 = vector.load %arg7[%c8_31, %c0_32] : memref<20x128xf32, #tpu.memory_space<vmem>>, vector<4x128xf32>
    tpu.vector_store %arg7[%c8_31, %c0_32], %66 {strides = array<i32>} : memref<20x128xf32, #tpu.memory_space<vmem>>, vector<4x128xf32>,
    %68 = arith.subf %59, %61 : vector<4x128xf32>
    %69 = math.absf %68 : vector<4x128xf32>
    %c12_33 = arith.constant 12 : index
    %c0_34 = arith.constant 0 : index
    %70 = vector.load %arg7[%c12_33, %c0_34] : memref<20x128xf32, #tpu.memory_space<vmem>>, vector<4x128xf32>
    tpu.vector_store %arg7[%c12_33, %c0_34], %69 {strides = array<i32>} : memref<20x128xf32, #tpu.memory_space<vmem>>, vector<4x128xf32>,
    %71 = arith.subf %60, %62 : vector<4x128xf32>
    %72 = math.absf %71 : vector<4x128xf32>
    %c16_35 = arith.constant 16 : index
    %c0_36 = arith.constant 0 : index
    %73 = vector.load %arg7[%c16_35, %c0_36] : memref<20x128xf32, #tpu.memory_space<vmem>>, vector<4x128xf32>
    tpu.vector_store %arg7[%c16_35, %c0_36], %72 {strides = array<i32>} : memref<20x128xf32, #tpu.memory_space<vmem>>, vector<4x128xf32>,
    %c0_37 = arith.constant 0 : index
    %c0_38 = arith.constant 0 : index
    %74 = vector.load %arg7[%c0_37, %c0_38] : memref<20x128xf32, #tpu.memory_space<vmem>>, vector<20x128xf32>
    %cst_39 = arith.constant dense<0.000000e+00> : vector<8x128xf32>
    %75 = tpu.matmul %3, %74, %cst_39 {dimension_numbers = #tpu.dot_dimension_numbers<[1], [0], [0], [1], [0, 0, 1, 1], [], []>} : vector<8x20xf32>, vector<20x128xf32>, vector<8x128xf32> -> vector<8x128xf32>
    %76 = vector.broadcast %4 : vector<8x1xf32> to vector<8x128xf32>
    %77 = arith.addf %75, %76 : vector<8x128xf32>
    %c1_40 = arith.constant 1 : index
    %c0_41 = arith.constant 0 : index
    %c0_42 = arith.constant 0 : index
    %78 = vector.load %arg6[%c1_40, %c0_41, %c0_42] : memref<2x8x128xf32, #tpu.memory_space<vmem>>, vector<1x8x128xf32>
    %79 = vector.shape_cast %78 : vector<1x8x128xf32> to vector<8x128xf32>
    %80 = vector.shape_cast %77 : vector<8x128xf32> to vector<1x8x128xf32>
    tpu.vector_store %arg6[%c1_40, %c0_41, %c0_42], %80 {strides = array<i32>} : memref<2x8x128xf32, #tpu.memory_space<vmem>>, vector<1x8x128xf32>,
    return
  }
  func.func @transform_0(%arg0: i32, %arg1: i32) -> (i32, i32, i32) {
    %c0_i32 = arith.constant 0 : i32
    %c0_i32_0 = arith.constant 0 : i32
    %c0_i32_1 = arith.constant 0 : i32
    return %arg0, %c0_i32, %c0_i32_0 : i32, i32, i32
  }
  func.func @transform_1(%arg0: i32, %arg1: i32) -> (i32, i32, i32) {
    %c0_i32 = arith.constant 0 : i32
    %c0_i32_0 = arith.constant 0 : i32
    return %arg0, %c0_i32, %arg1 : i32, i32, i32
  }
  func.func @transform_2(%arg0: i32, %arg1: i32) -> (i32, i32) {
    %c0_i32 = arith.constant 0 : i32
    %c0_i32_0 = arith.constant 0 : i32
    %c0_i32_1 = arith.constant 0 : i32
    return %c0_i32, %c0_i32_0 : i32, i32
  }
  func.func @transform_3(%arg0: i32, %arg1: i32) -> (i32, i32) {
    %c0_i32 = arith.constant 0 : i32
    %c0_i32_0 = arith.constant 0 : i32
    %c0_i32_1 = arith.constant 0 : i32
    return %c0_i32, %c0_i32_0 : i32, i32
  }
  func.func @transform_4(%arg0: i32, %arg1: i32) -> (i32, i32, i32) {
    %c0_i32 = arith.constant 0 : i32
    %c0_i32_0 = arith.constant 0 : i32
    return %arg0, %c0_i32, %arg1 : i32, i32, i32
  }
}

</mosaic_0001>

<bundles_post_ra>
// kernel: tpu_custom_call.1
= control target key start
LH: loop header
LB: loop body
LE: loop exit
PB: predicated region body
PF: predicated region fallthrough
CT: control target
= control target key end

     0   :  { %v18_v0 = vlaneseq  ;;  %v1700_v2 = vmov 0.0   ;;  %s2375_s0 = inlined_call_operand.vmem [shape: f32[2,4,128], index: 0, kind: input, shape index: {}]   ;;  %s2376_s1 = inlined_call_operand.vmem [shape: s32[2,5,128], index: 1, kind: input, shape index: {}]   ;;  %s2377_s2 = inlined_call_operand.vmem [shape: f32[8,20], index: 2, kind: input, shape index: {}]   ;;  %s2378_s3 = inlined_call_operand.vmem [shape: f32[8,1], index: 3, kind: input, shape index: {}]   ;;  %s2379_s4 = inlined_call_operand.hbm [shape: f32[2,8,128], index: 4, kind: output, shape index: {}]  }
   0x1   :  { %v1735_v1 = vld [vmem:[%s2376_s1] sm:$0x1f]  ;;  %383 = vmatprep.mubr.f32.mxu0 %v1700_v2  ;;  %454 = vmatprep.mubr.f32.mxu1 %v1700_v2 }
   0x2   :  { %9 = vsyncpa [#allocation4], 0  ;;  %v1739_v3 = vshrl.u32 %v18_v0, 7  ;;  %v55_v4 = vrot.slane %v1735_v1, 1  ;;  %v57_v5 = vrot.slane %v1735_v1, 3  ;;  %v56_v6 = vrot.slane %v1735_v1, 2 }
   0x3   :  { %v1701_v22 = vmov 1.0   ;;  %v58_v44 = vrot.slane %v1735_v1, 4  ;;  %v53_v46 = vld [vmem:[%s2375_s0] sm:$0xf]  ;;  %v2080_v47 = vld [vmem:[%s2376_s1 + $0x8] sm:$0x1f] }
   0x4   :  { %v34_v7 = vadd.s32 120, %v1739_v3  ;;  %v1746_v8 = vsub.s32 0, %v1739_v3  ;;  %v33_v9 = vadd.s32 112, %v1739_v3  ;;  %v32_v10 = vadd.s32 104, %v1739_v3  ;;  %v2189_v52 = vld [vmem:[%s2375_s0 + $0x4] sm:$0xf] }
   0x5   :  { %v31_v11 = vadd.s32 96, %v1739_v3  ;;  %v30_v12 = vadd.s32 88, %v1739_v3  ;;  %v29_v20 = vadd.s32 80, %v1739_v3  ;;  %v28_v23 = vadd.s32 72, %v1739_v3  ;;  %v52_v53 = vld [vmem:[%s2378_s3] sm:$0xff] }
   0x6   :  { %v1752_v13 = vadd.s32 1, %v34_v7  ;;  %v1755_v14 = vrot.slane %v55_v4, %v1746_v8  ;;  %v1758_v15 = vrot.slane %v57_v5, %v1746_v8  ;;  %v1762_v16 = vrot.slane %v1735_v1, %v1746_v8 }
   0x7   :  { %v1765_v17 = vrot.slane %v56_v6, %v1746_v8  ;;  %v1767_v18 = vadd.s32 1, %v33_v9  ;;  %v1769_v19 = vadd.s32 1, %v32_v10  ;;  %v1778_v21 = vadd.s32 1, %v31_v11  ;;  %v2211_v10 = vld [vmem:[%s2377_s2] sm:$0xff]  ;;  %s1704_s2 = smov [#allocation3]  }
   0x8   :  { %vm155_vm0 = vcmp.eq.s32.totalorder %v1752_v13, %v1755_v14  ;;  %vm157_vm1 = vcmp.eq.s32.totalorder %v1752_v13, %v1758_v15  ;;  %vm154_vm2 = vcmp.eq.s32.totalorder %v1752_v13, %v1762_v16  ;;  %v1797_v24 = vadd.s32 1, %v30_v12  ;;  %s1203_s24 = sshll.u32 %s1704_s2, 4  ;;  %s1204_s24 = int_to_ptr.vmem [resolvable:$true] %s1203_s24 }
   0x9   :  { %1294 = vmatprep.subr.msk.mxu0 %vm155_vm0, %v1701_v22  ;;  %1326 = vmatprep.subr.msk.mxu1 %vm157_vm1, %v1701_v22  ;;  %vm156_vm3 = vcmp.eq.s32.totalorder %v1752_v13, %v1765_v17  ;;  %vm150_vm4 = vcmp.eq.s32.totalorder %v1767_v18, %v1755_v14  ;;  %vm152_vm5 = vcmp.eq.s32.totalorder %v1767_v18, %v1758_v15  ;;  %v1813_v25 = vadd.s32 1, %v29_v20  ;;  %s1678_s25 = scalar_lea.vmem %s1204_s24, 256  ;;  %p1683_p1 = scmp.lt.s32.totalorder %s1204_s24, %s1204_s24 }
   0xa   :  { %1295 = vmatpush1.msk.msra.mxu0 %vm154_vm2, %v1701_v22  ;;  %1327 = vmatpush1.msk.msra.mxu1 %vm156_vm3, %v1701_v22  ;;  %vm149_vm6 = vcmp.eq.s32.totalorder %v1767_v18, %v1762_v16  ;;  %vm151_vm7 = vcmp.eq.s32.totalorder %v1767_v18, %v1765_v17  ;;  %vm145_vm8 = vcmp.eq.s32.totalorder %v1769_v19, %v1755_v14  ;;  %v27_v26 = vadd.s32 64, %v1739_v3  ;;  %p1679_p0 = scmp.ne.s32.totalorder %s1204_s24, %s1678_s25  ;;  %p1684_p2 = scmp.lt.s32.totalorder %s1678_s25, %s1678_s25 }
   0xb   :  { %1296 = vmatprep.subr.msk.mxu0 %vm150_vm4, %v1701_v22  ;;  %1328 = vmatprep.subr.msk.mxu1 %vm152_vm5, %v1701_v22  ;;  %vm147_vm9 = vcmp.eq.s32.totalorder %v1769_v19, %v1758_v15  ;;  %vm144_vm10 = vcmp.eq.s32.totalorder %v1769_v19, %v1762_v16  ;;  %vm146_vm11 = vcmp.eq.s32.totalorder %v1769_v19, %v1765_v17  ;;  %v1828_v27 = vadd.s32 1, %v28_v23 }
   0xc   :  { %1297 = vmatpush1.msk.msra.mxu0 %vm149_vm6, %v1701_v22  ;;  %1329 = vmatpush1.msk.msra.mxu1 %vm151_vm7, %v1701_v22  ;;  %vm140_vm12 = vcmp.eq.s32.totalorder %v1778_v21, %v1755_v14  ;;  %vm142_vm13 = vcmp.eq.s32.totalorder %v1778_v21, %v1758_v15  ;;  %vm139_vm14 = vcmp.eq.s32.totalorder %v1778_v21, %v1762_v16  ;;  %v26_v28 = vadd.s32 56, %v1739_v3  ;;  %p1685_p3 = por %p1684_p2, %p1683_p1 }
   0xd   :  { %1298 = vmatprep.subr.msk.mxu0 %vm145_vm8, %v1701_v22  ;;  %1330 = vmatprep.subr.msk.mxu1 %vm147_vm9, %v1701_v22  ;;  %vm141_vm15 = vcmp.eq.s32.totalorder %v1778_v21, %v1765_v17  ;;  %vm135_vm0 = vcmp.eq.s32.totalorder %v1797_v24, %v1755_v14  ;;  %vm137_vm1 = vcmp.eq.s32.totalorder %v1797_v24, %v1758_v15  ;;  %v1843_v29 = vadd.s32 1, %v27_v26 }
   0xe   :  { %1299 = vmatpush1.msk.msra.mxu0 %vm144_vm10, %v1701_v22  ;;  %1331 = vmatpush1.msk.msra.mxu1 %vm146_vm11, %v1701_v22  ;;  %vm134_vm2 = vcmp.eq.s32.totalorder %v1797_v24, %v1762_v16  ;;  %vm136_vm3 = vcmp.eq.s32.totalorder %v1797_v24, %v1765_v17  ;;  %vm130_vm4 = vcmp.eq.s32.totalorder %v1813_v25, %v1755_v14  ;;  %v25_v30 = vadd.s32 48, %v1739_v3  ;;  %p1686_p4 = pnand %p1685_p3, %p1679_p0 }
   0xf   :  { %1300 = vmatprep.subr.msk.mxu0 %vm140_vm12, %v1701_v22  ;;  %1332 = vmatprep.subr.msk.mxu1 %vm142_vm13, %v1701_v22  ;;  %vm132_vm5 = vcmp.eq.s32.totalorder %v1813_v25, %v1758_v15  ;;  %vm129_vm6 = vcmp.eq.s32.totalorder %v1813_v25, %v1762_v16  ;;  %vm131_vm7 = vcmp.eq.s32.totalorder %v1813_v25, %v1765_v17  ;;  %v1858_v31 = vadd.s32 1, %v26_v28 }
  0x10   :  { %1301 = vmatpush1.msk.msra.mxu0 %vm139_vm14, %v1701_v22  ;;  %1333 = vmatpush1.msk.msra.mxu1 %vm141_vm15, %v1701_v22  ;;  %vm125_vm8 = vcmp.eq.s32.totalorder %v1828_v27, %v1755_v14  ;;  %vm127_vm9 = vcmp.eq.s32.totalorder %v1828_v27, %v1758_v15  ;;  %v24_v32 = vadd.s32 40, %v1739_v3  ;;  %vm124_vm10 = vcmp.eq.s32.totalorder %v1828_v27, %v1762_v16 }
  0x11   :  { %1302 = vmatprep.subr.msk.mxu0 %vm135_vm0, %v1701_v22  ;;  %1334 = vmatprep.subr.msk.mxu1 %vm137_vm1, %v1701_v22  ;;  %vm126_vm11 = vcmp.eq.s32.totalorder %v1828_v27, %v1765_v17  ;;  %vm120_vm12 = vcmp.eq.s32.totalorder %v1843_v29, %v1755_v14  ;;  %vm122_vm13 = vcmp.eq.s32.totalorder %v1843_v29, %v1758_v15  ;;  %v1873_v33 = vadd.s32 1, %v25_v30 }
  0x12   :  { %1303 = vmatpush1.msk.msra.mxu0 %vm134_vm2, %v1701_v22  ;;  %1335 = vmatpush1.msk.msra.mxu1 %vm136_vm3, %v1701_v22  ;;  %v23_v34 = vadd.s32 32, %v1739_v3  ;;  %vm119_vm14 = vcmp.eq.s32.totalorder %v1843_v29, %v1762_v16  ;;  %vm121_vm15 = vcmp.eq.s32.totalorder %v1843_v29, %v1765_v17  ;;  %vm115_vm0 = vcmp.eq.s32.totalorder %v1858_v31, %v1755_v14 }
  0x13   :  { %1304 = vmatprep.subr.msk.mxu0 %vm130_vm4, %v1701_v22  ;;  %1336 = vmatprep.subr.msk.mxu1 %vm132_vm5, %v1701_v22  ;;  %vm117_vm1 = vcmp.eq.s32.totalorder %v1858_v31, %v1758_v15  ;;  %v1888_v35 = vadd.s32 1, %v24_v32  ;;  %v22_v36 = vadd.s32 24, %v1739_v3  ;;  %vm114_vm2 = vcmp.eq.s32.totalorder %v1858_v31, %v1762_v16 }
  0x14   :  { %1305 = vmatpush1.msk.msra.mxu0 %vm129_vm6, %v1701_v22  ;;  %1337 = vmatpush1.msk.msra.mxu1 %vm131_vm7, %v1701_v22  ;;  %vm116_vm3 = vcmp.eq.s32.totalorder %v1858_v31, %v1765_v17  ;;  %vm110_vm4 = vcmp.eq.s32.totalorder %v1873_v33, %v1755_v14  ;;  %vm112_vm5 = vcmp.eq.s32.totalorder %v1873_v33, %v1758_v15  ;;  %v1903_v37 = vadd.s32 1, %v23_v34 }
  0x15   :  { %1306 = vmatprep.subr.msk.mxu0 %vm125_vm8, %v1701_v22  ;;  %1338 = vmatprep.subr.msk.mxu1 %vm127_vm9, %v1701_v22  ;;  %v21_v38 = vadd.s32 16, %v1739_v3  ;;  %vm109_vm6 = vcmp.eq.s32.totalorder %v1873_v33, %v1762_v16  ;;  %vm111_vm7 = vcmp.eq.s32.totalorder %v1873_v33, %v1765_v17  ;;  %vm105_vm8 = vcmp.eq.s32.totalorder %v1888_v35, %v1755_v14 }
  0x16   :  { %1307 = vmatpush1.msk.msra.mxu0 %vm124_vm10, %v1701_v22  ;;  %1339 = vmatpush1.msk.msra.mxu1 %vm126_vm11, %v1701_v22  ;;  %vm107_vm9 = vcmp.eq.s32.totalorder %v1888_v35, %v1758_v15  ;;  %v1918_v39 = vadd.s32 1, %v22_v36  ;;  %v20_v40 = vadd.s32 8, %v1739_v3  ;;  %vm104_vm10 = vcmp.eq.s32.totalorder %v1888_v35, %v1762_v16 }
  0x17   :  { %1308 = vmatprep.subr.msk.mxu0 %vm120_vm12, %v1701_v22  ;;  %1340 = vmatprep.subr.msk.mxu1 %vm122_vm13, %v1701_v22  ;;  %vm106_vm11 = vcmp.eq.s32.totalorder %v1888_v35, %v1765_v17  ;;  %vm100_vm12 = vcmp.eq.s32.totalorder %v1903_v37, %v1755_v14  ;;  %vm102_vm13 = vcmp.eq.s32.totalorder %v1903_v37, %v1758_v15  ;;  %v1933_v41 = vadd.s32 1, %v21_v38 }
  0x18   :  { %1309 = vmatpush1.msk.msra.mxu0 %vm119_vm14, %v1701_v22  ;;  %1341 = vmatpush1.msk.msra.mxu1 %vm121_vm15, %v1701_v22  ;;  %vm99_vm14 = vcmp.eq.s32.totalorder %v1903_v37, %v1762_v16  ;;  %vm101_vm15 = vcmp.eq.s32.totalorder %v1903_v37, %v1765_v17  ;;  %v1947_v42 = vadd.s32 1, %v20_v40  ;;  %v1962_v43 = vadd.s32 1, %v1739_v3 }
  0x19   :  { %1310 = vmatprep.subr.msk.mxu0 %vm115_vm0, %v1701_v22  ;;  %1342 = vmatprep.subr.msk.mxu1 %vm117_vm1, %v1701_v22  ;;  %vm95_vm0 = vcmp.eq.s32.totalorder %v1918_v39, %v1755_v14  ;;  %vm97_vm1 = vcmp.eq.s32.totalorder %v1918_v39, %v1758_v15  ;;  %v1990_v45 = vrot.slane %v58_v44, %v1746_v8  ;;  %v635_v48 = vrot.slane %v2080_v47, 3 }
  0x1a   :  { %1311 = vmatpush1.msk.msra.mxu0 %vm114_vm2, %v1701_v22  ;;  %1343 = vmatpush1.msk.msra.mxu1 %vm116_vm3, %v1701_v22  ;;  %vm94_vm2 = vcmp.eq.s32.totalorder %v1918_v39, %v1762_v16  ;;  %vm96_vm3 = vcmp.eq.s32.totalorder %v1918_v39, %v1765_v17  ;;  %v634_v49 = vrot.slane %v2080_v47, 2  ;;  %v1703_v54 = vmov 0  }
  0x1b   :  { %1312 = vmatprep.subr.msk.mxu0 %vm110_vm4, %v1701_v22  ;;  %1344 = vmatprep.subr.msk.mxu1 %vm112_vm5, %v1701_v22  ;;  %vm90_vm4 = vcmp.eq.s32.totalorder %v1933_v41, %v1755_v14  ;;  %vm92_vm5 = vcmp.eq.s32.totalorder %v1933_v41, %v1758_v15  ;;  %v2085_v50 = vrot.slane %v635_v48, %v1746_v8  ;;  %v633_v4 = vrot.slane %v2080_v47, 1 }
  0x1c   :  { %1313 = vmatpush1.msk.msra.mxu0 %vm109_vm6, %v1701_v22  ;;  %1345 = vmatpush1.msk.msra.mxu1 %vm111_vm7, %v1701_v22  ;;  %vm89_vm6 = vcmp.eq.s32.totalorder %v1933_v41, %v1762_v16  ;;  %vm91_vm7 = vcmp.eq.s32.totalorder %v1933_v41, %v1765_v17  ;;  %v2088_v51 = vrot.slane %v634_v49, %v1746_v8  ;;  %v636_v12 = vrot.slane %v2080_v47, 4 }
  0x1d   :  { %1314 = vmatprep.subr.msk.mxu0 %vm105_vm8, %v1701_v22  ;;  %1346 = vmatprep.subr.msk.mxu1 %vm107_vm9, %v1701_v22  ;;  %vm85_vm8 = vcmp.eq.s32.totalorder %v1947_v42, %v1755_v14  ;;  %vm87_vm9 = vcmp.eq.s32.totalorder %v1947_v42, %v1758_v15  ;;  %v2200_v5 = vrot.slane %v633_v4, %v1746_v8 }
  0x1e   :  { %1315 = vmatpush1.msk.msra.mxu0 %vm104_vm10, %v1701_v22  ;;  %1347 = vmatpush1.msk.msra.mxu1 %vm106_vm11, %v1701_v22  ;;  %vm84_vm10 = vcmp.eq.s32.totalorder %v1947_v42, %v1762_v16  ;;  %vm86_vm11 = vcmp.eq.s32.totalorder %v1947_v42, %v1765_v17  ;;  %v2204_v7 = vrot.slane %v2080_v47, %v1746_v8 }
  0x1f   :  { %1316 = vmatprep.subr.msk.mxu0 %vm100_vm12, %v1701_v22  ;;  %1348 = vmatprep.subr.msk.mxu1 %vm102_vm13, %v1701_v22  ;;  %vm80_vm12 = vcmp.eq.s32.totalorder %v1962_v43, %v1755_v14  ;;  %vm82_vm13 = vcmp.eq.s32.totalorder %v1962_v43, %v1758_v15  ;;  %v656_v14 = vrot.slane %v636_v12, %v1746_v8 }
  0x20   :  { %1317 = vmatpush1.msk.msra.mxu0 %vm99_vm14, %v1701_v22  ;;  %1349 = vmatpush1.msk.msra.mxu1 %vm101_vm15, %v1701_v22  ;;  %vm79_vm14 = vcmp.eq.s32.totalorder %v1962_v43, %v1762_v16  ;;  %vm81_vm15 = vcmp.eq.s32.totalorder %v1962_v43, %v1765_v17 }
  0x21   :  { %1318 = vmatprep.subr.msk.mxu0 %vm95_vm0, %v1701_v22  ;;  %1350 = vmatprep.subr.msk.mxu1 %vm97_vm1, %v1701_v22  ;;  %vm158_vm0 = vcmp.eq.s32.totalorder %v1752_v13, %v1990_v45  ;;  %vm153_vm1 = vcmp.eq.s32.totalorder %v1767_v18, %v1990_v45 }
  0x22   :  { %1319 = vmatpush1.msk.msra.mxu0 %vm94_vm2, %v1701_v22  ;;  %1351 = vmatpush1.msk.msra.mxu1 %vm96_vm3, %v1701_v22  ;;  %vm1702_vm2 = vmmov 0   ;;  %vm148_vm3 = vcmp.eq.s32.totalorder %v1769_v19, %v1990_v45 }
  0x23   :  { %1320 = vmatprep.subr.msk.mxu0 %vm90_vm4, %v1701_v22  ;;  %1352 = vmatprep.subr.msk.mxu1 %vm92_vm5, %v1701_v22  ;;  %vm143_vm4 = vcmp.eq.s32.totalorder %v1778_v21, %v1990_v45  ;;  %vm138_vm5 = vcmp.eq.s32.totalorder %v1797_v24, %v1990_v45 }
  0x24   :  { %1321 = vmatpush1.msk.msra.mxu0 %vm89_vm6, %v1701_v22  ;;  %1353 = vmatpush1.msk.msra.mxu1 %vm91_vm7, %v1701_v22  ;;  %vm133_vm6 = vcmp.eq.s32.totalorder %v1813_v25, %v1990_v45  ;;  %vm128_vm7 = vcmp.eq.s32.totalorder %v1828_v27, %v1990_v45 }
  0x25   :  { %1322 = vmatprep.subr.msk.mxu0 %vm85_vm8, %v1701_v22  ;;  %1354 = vmatprep.subr.msk.mxu1 %vm87_vm9, %v1701_v22  ;;  %vm123_vm8 = vcmp.eq.s32.totalorder %v1843_v29, %v1990_v45  ;;  %vm118_vm9 = vcmp.eq.s32.totalorder %v1858_v31, %v1990_v45 }
  0x26   :  { %1323 = vmatpush1.msk.msra.mxu0 %vm84_vm10, %v1701_v22  ;;  %1355 = vmatpush1.msk.msra.mxu1 %vm86_vm11, %v1701_v22  ;;  %vm113_vm10 = vcmp.eq.s32.totalorder %v1873_v33, %v1990_v45  ;;  %vm108_vm11 = vcmp.eq.s32.totalorder %v1888_v35, %v1990_v45 }
  0x27   :  { %1324 = vmatprep.subr.msk.mxu0 %vm80_vm12, %v1701_v22  ;;  %1356 = vmatprep.subr.msk.mxu1 %vm82_vm13, %v1701_v22  ;;  %vm103_vm12 = vcmp.eq.s32.totalorder %v1903_v37, %v1990_v45  ;;  %vm98_vm13 = vcmp.eq.s32.totalorder %v1918_v39, %v1990_v45 }
  0x28   :  { %1325 = vmatpush1.msk.msra.mxu0 %vm79_vm14, %v1701_v22  ;;  %1357 = vmatpush1.msk.msra.mxu1 %vm81_vm15, %v1701_v22  ;;  %vm93_vm14 = vcmp.eq.s32.totalorder %v1933_v41, %v1990_v45  ;;  %vm88_vm15 = vcmp.eq.s32.totalorder %v1947_v42, %v1990_v45 }
  0x29   :  { %384 = vmatmul.mubr.f32.vlgmr.msra.gmra.mxu0 %v53_v46  ;;  %455 = vmatmul.mubr.f32.vlgmr.msra.gmra.mxu1 %v53_v46 }
  0x2a   :  { %1582 = vmatprep.subr.mxu0 %v1700_v2  ;;  %1614 = vmatprep.mubr.msk.f32.mxu0 %vm1702_vm2, %v1700_v2 }
  0x2b   :  { %1583 = vmatpush3.msk.msra.mxu0 %vm158_vm0, %v1701_v22  ;;  %1617 = vmatprep.subr.mxu1 %v1700_v2  ;;  %vm83_vm0 = vcmp.eq.s32.totalorder %v1962_v43, %v1990_v45 }
  0x2c   :  { %1584 = vmatprep.subr.mxu0 %v1700_v2  ;;  %1623 = vmatprep.mubr.msk.f32.mxu1 %vm1702_vm2, %v1700_v2 }
  0x2d   :  { %1585 = vmatpush3.msk.msra.mxu0 %vm153_vm1, %v1701_v22  ;;  %vm735_vm1 = vcmp.eq.s32.totalorder %v1752_v13, %v2085_v50  ;;  %1677 = vset.pattern.permute.xlu0 %v1703_v54 }
  0x2e   :  { %1586 = vmatprep.subr.mxu0 %v1700_v2  ;;  %547 = vperm.xlu0 %1677, %v52_v53  }
  0x2f   :  { %1587 = vmatpush3.msk.msra.mxu0 %vm148_vm3, %v1701_v22  ;;  %vm734_vm3 = vcmp.eq.s32.totalorder %v1752_v13, %v2088_v51 }
  0x30   :  { %1588 = vmatprep.subr.mxu0 %v1700_v2 }
  0x31   :  { %1589 = vmatpush3.msk.msra.mxu0 %vm143_vm4, %v1701_v22  ;;  %vm730_vm4 = vcmp.eq.s32.totalorder %v1767_v18, %v2085_v50 }
  0x32   :  { %1590 = vmatprep.subr.mxu0 %v1700_v2 }
  0x33   :  { %1591 = vmatpush3.msk.msra.mxu0 %vm138_vm5, %v1701_v22  ;;  %vm729_vm5 = vcmp.eq.s32.totalorder %v1767_v18, %v2088_v51 }
  0x34   :  { %1592 = vmatprep.subr.mxu0 %v1700_v2 }
  0x35   :  { %1593 = vmatpush3.msk.msra.mxu0 %vm133_vm6, %v1701_v22  ;;  %vm725_vm6 = vcmp.eq.s32.totalorder %v1769_v19, %v2085_v50 }
  0x36   :  { %1594 = vmatprep.subr.mxu0 %v1700_v2 }
  0x37   :  { %1595 = vmatpush3.msk.msra.mxu0 %vm128_vm7, %v1701_v22  ;;  %vm724_vm7 = vcmp.eq.s32.totalorder %v1769_v19, %v2088_v51 }
  0x38   :  { %1596 = vmatprep.subr.mxu0 %v1700_v2 }
  0x39   :  { %1597 = vmatpush3.msk.msra.mxu0 %vm123_vm8, %v1701_v22  ;;  %vm720_vm8 = vcmp.eq.s32.totalorder %v1778_v21, %v2085_v50 }
  0x3a   :  { %1598 = vmatprep.subr.mxu0 %v1700_v2 }
  0x3b   :  { %1599 = vmatpush3.msk.msra.mxu0 %vm118_vm9, %v1701_v22  ;;  %vm719_vm9 = vcmp.eq.s32.totalorder %v1778_v21, %v2088_v51 }
  0x3c   :  { %1600 = vmatprep.subr.mxu0 %v1700_v2 }
  0x3d   :  { %1601 = vmatpush3.msk.msra.mxu0 %vm113_vm10, %v1701_v22  ;;  %vm715_vm10 = vcmp.eq.s32.totalorder %v1797_v24, %v2085_v50 }
  0x3e   :  { %1602 = vmatprep.subr.mxu0 %v1700_v2 }
  0x3f   :  { %1603 = vmatpush3.msk.msra.mxu0 %vm108_vm11, %v1701_v22  ;;  %vm714_vm11 = vcmp.eq.s32.totalorder %v1797_v24, %v2088_v51 }
  0x40   :  { %1604 = vmatprep.subr.mxu0 %v1700_v2 }
  0x41   :  { %1605 = vmatpush3.msk.msra.mxu0 %vm103_vm12, %v1701_v22  ;;  %vm710_vm12 = vcmp.eq.s32.totalorder %v1813_v25, %v2085_v50 }
  0x42   :  { %1606 = vmatprep.subr.mxu0 %v1700_v2 }
  0x43   :  { %1607 = vmatpush3.msk.msra.mxu0 %vm98_vm13, %v1701_v22  ;;  %vm709_vm13 = vcmp.eq.s32.totalorder %v1813_v25, %v2088_v51 }
  0x44   :  { %1608 = vmatprep.subr.mxu0 %v1700_v2 }
  0x45   :  { %1609 = vmatpush3.msk.msra.mxu0 %vm93_vm14, %v1701_v22  ;;  %vm705_vm14 = vcmp.eq.s32.totalorder %v1828_v27, %v2085_v50 }
  0x46   :  { %1610 = vmatprep.subr.mxu0 %v1700_v2 }
  0x47   :  { %1611 = vmatpush3.msk.msra.mxu0 %vm88_vm15, %v1701_v22  ;;  %vm704_vm15 = vcmp.eq.s32.totalorder %v1828_v27, %v2088_v51 }
  0x48   :  { %1612 = vmatprep.subr.mxu0 %v1700_v2 }
  0x49   :  { %1613 = vmatpush3.msk.msra.mxu0 %vm83_vm0, %v1701_v22  ;;  %vm700_vm0 = vcmp.eq.s32.totalorder %v1843_v29, %v2085_v50 }
  0x4a   :  { %1615 = vmatmul.mubr.f32.vlgmr.msra.gmra.mxu0 %v53_v46  ;;  %1490 = vmatprep.subr.msk.mxu0 %vm735_vm1, %v1701_v22  ;;  %vm699_vm1 = vcmp.eq.s32.totalorder %v1843_v29, %v2088_v51 }
  0x4b   :  { %1032 = vmatprep.mubr.f32.mxu0 %v1700_v2  ;;  %1491 = vmatpush1.msk.msra.mxu0 %vm734_vm3, %v1701_v22  ;;  %vm695_vm3 = vcmp.eq.s32.totalorder %v1858_v31, %v2085_v50 }
  0x4c   :  { %1492 = vmatprep.subr.msk.mxu0 %vm730_vm4, %v1701_v22  ;;  %vm694_vm4 = vcmp.eq.s32.totalorder %v1858_v31, %v2088_v51 }
  0x4d   :  { %1493 = vmatpush1.msk.msra.mxu0 %vm729_vm5, %v1701_v22  ;;  %vm690_vm5 = vcmp.eq.s32.totalorder %v1873_v33, %v2085_v50 }
  0x4e   :  { %1494 = vmatprep.subr.msk.mxu0 %vm725_vm6, %v1701_v22  ;;  %vm689_vm6 = vcmp.eq.s32.totalorder %v1873_v33, %v2088_v51 }
  0x4f   :  { %1495 = vmatpush1.msk.msra.mxu0 %vm724_vm7, %v1701_v22  ;;  %vm685_vm7 = vcmp.eq.s32.totalorder %v1888_v35, %v2085_v50 }
  0x50   :  { %1496 = vmatprep.subr.msk.mxu0 %vm720_vm8, %v1701_v22  ;;  %vm684_vm8 = vcmp.eq.s32.totalorder %v1888_v35, %v2088_v51 }
  0x51   :  { %1497 = vmatpush1.msk.msra.mxu0 %vm719_vm9, %v1701_v22  ;;  %vm680_vm9 = vcmp.eq.s32.totalorder %v1903_v37, %v2085_v50 }
  0x52   :  { %1498 = vmatprep.subr.msk.mxu0 %vm715_vm10, %v1701_v22  ;;  %vm679_vm10 = vcmp.eq.s32.totalorder %v1903_v37, %v2088_v51 }
  0x53   :  { %1499 = vmatpush1.msk.msra.mxu0 %vm714_vm11, %v1701_v22  ;;  %vm675_vm11 = vcmp.eq.s32.totalorder %v1918_v39, %v2085_v50 }
  0x54   :  { %1500 = vmatprep.subr.msk.mxu0 %vm710_vm12, %v1701_v22  ;;  %vm674_vm12 = vcmp.eq.s32.totalorder %v1918_v39, %v2088_v51 }
  0x55   :  { %1501 = vmatpush1.msk.msra.mxu0 %vm709_vm13, %v1701_v22  ;;  %vm670_vm13 = vcmp.eq.s32.totalorder %v1933_v41, %v2085_v50 }
  0x56   :  { %1502 = vmatprep.subr.msk.mxu0 %vm705_vm14, %v1701_v22  ;;  %vm669_vm14 = vcmp.eq.s32.totalorder %v1933_v41, %v2088_v51 }
  0x57   :  { %1503 = vmatpush1.msk.msra.mxu0 %vm704_vm15, %v1701_v22  ;;  %vm665_vm15 = vcmp.eq.s32.totalorder %v1947_v42, %v2085_v50 }
  0x58   :  { %1504 = vmatprep.subr.msk.mxu0 %vm700_vm0, %v1701_v22  ;;  %vm664_vm0 = vcmp.eq.s32.totalorder %v1947_v42, %v2088_v51 }
  0x59   :  { %1505 = vmatpush1.msk.msra.mxu0 %vm699_vm1, %v1701_v22  ;;  %vm660_vm1 = vcmp.eq.s32.totalorder %v1962_v43, %v2085_v50 }
  0x5a   :  { %1506 = vmatprep.subr.msk.mxu0 %vm695_vm3, %v1701_v22  ;;  %vm659_vm3 = vcmp.eq.s32.totalorder %v1962_v43, %v2088_v51 }
  0x5b   :  { %1507 = vmatpush1.msk.msra.mxu0 %vm694_vm4, %v1701_v22  ;;  %vm554_vm4 = vcmask 1043456  }
  0x5c   :  { %1508 = vmatprep.subr.msk.mxu0 %vm690_vm5, %v1701_v22  ;;  %vm550_vm5 = vcmask 162816  }
  0x5d   :  { %1509 = vmatpush1.msk.msra.mxu0 %vm689_vm6, %v1701_v22  ;;  %vm733_vm6 = vcmp.eq.s32.totalorder %v1752_v13, %v2200_v5 }
  0x5e   :  { %1510 = vmatprep.subr.msk.mxu0 %vm685_vm7, %v1701_v22  ;;  %vm732_vm7 = vcmp.eq.s32.totalorder %v1752_v13, %v2204_v7 }
  0x5f   :  { %1511 = vmatpush1.msk.msra.mxu0 %vm684_vm8, %v1701_v22  ;;  %vm728_vm8 = vcmp.eq.s32.totalorder %v1767_v18, %v2200_v5 }
  0x60   :  { %1512 = vmatprep.subr.msk.mxu0 %vm680_vm9, %v1701_v22  ;;  %vm727_vm9 = vcmp.eq.s32.totalorder %v1767_v18, %v2204_v7 }
  0x61   :  { %1513 = vmatpush1.msk.msra.mxu0 %vm679_vm10, %v1701_v22  ;;  %vm723_vm10 = vcmp.eq.s32.totalorder %v1769_v19, %v2200_v5 }
  0x62   :  { %1514 = vmatprep.subr.msk.mxu0 %vm675_vm11, %v1701_v22  ;;  %vm722_vm11 = vcmp.eq.s32.totalorder %v1769_v19, %v2204_v7 }
  0x63   :  { %1515 = vmatpush1.msk.msra.mxu0 %vm674_vm12, %v1701_v22  ;;  %vm718_vm12 = vcmp.eq.s32.totalorder %v1778_v21, %v2200_v5 }
  0x64   :  { %1516 = vmatprep.subr.msk.mxu0 %vm670_vm13, %v1701_v22  ;;  %vm717_vm13 = vcmp.eq.s32.totalorder %v1778_v21, %v2204_v7 }
  0x65   :  { %1517 = vmatpush1.msk.msra.mxu0 %vm669_vm14, %v1701_v22  ;;  %vm713_vm14 = vcmp.eq.s32.totalorder %v1797_v24, %v2200_v5 }
  0x66   :  { %1518 = vmatprep.subr.msk.mxu0 %vm665_vm15, %v1701_v22  ;;  %vm712_vm15 = vcmp.eq.s32.totalorder %v1797_v24, %v2204_v7 }
  0x67   :  { %1519 = vmatpush1.msk.msra.mxu0 %vm664_vm0, %v1701_v22  ;;  %vm708_vm0 = vcmp.eq.s32.totalorder %v1813_v25, %v2200_v5 }
  0x68   :  { %1520 = vmatprep.subr.msk.mxu0 %vm660_vm1, %v1701_v22  ;;  %vm707_vm1 = vcmp.eq.s32.totalorder %v1813_v25, %v2204_v7 }
  0x69   :  { %1521 = vmatpush1.msk.msra.mxu0 %vm659_vm3, %v1701_v22  ;;  %vm703_vm3 = vcmp.eq.s32.totalorder %v1828_v27, %v2200_v5 }
  0x6a   :  { %1033 = vmatmul.mubr.f32.vlgmr.msra.gmra.mxu0 %v2189_v52  ;;  %1661 = vmatprep.subr.mxu0 %v1700_v2 }
  0x6b   :  { %1667 = vmatprep.mubr.msk.f32.mxu0 %vm1702_vm2, %v1700_v2 }
  0xa9   :  { %v548_v8 = vpop.permute.xlu0 %547 }
  0xe9   :  { %v385_v55 = vpop.f32.mrf.mxu0  ;;  %v456_v56 = vpop.f32.mrf.mxu1 }
  0xea   :  { %531 = vst [vmem:[#allocation2] sm:$0xf] %v385_v55 }
  0xeb   :  { %v387_v57 = vpop.f32.mrf.mxu0  ;;  %v458_v58 = vpop.f32.mrf.mxu1 }
  0xec   :  { %v532_v59 = vadd.f32 %v458_v58, %v387_v57  ;;  %v536_v60 = vsub.f32 %v387_v57, %v458_v58 }
  0xee   :  { %533 = vst [vmem:[#allocation2 + $0x4] sm:$0xf] %v532_v59  ;;  %v537_v61 = vand.u32 2147483647, %v536_v60 }
  0xf0   :  { %538 = vst [vmem:[#allocation2 + $0xc] sm:$0xf] %v537_v61 }
  0xf5   :  { %v542_v11 = vld [vmem:[#allocation2] sm:$0xff] }
 0x10a   :  { %v527_v62 = vpop.f32.mrf.mxu0 }
 0x10b   :  { %v534_v63 = vadd.f32 %v527_v62, %v456_v56  ;;  %v539_v0 = vsub.f32 %v456_v56, %v527_v62 }
 0x10c   :  { %v1616_v1 = vpop.f32.mrf.mxu0 }
 0x10d   :  { %535 = vst [vmem:[#allocation2 + $0x8] sm:$0xf] %v534_v63  ;;  %v540_v3 = vand.u32 2147483647, %v539_v0 }
 0x10f   :  { %541 = vst [vmem:[#allocation2 + $0x10] sm:$0xf] %v540_v3 }
 0x114   :  { %v543_v9 = vld [vmem:[#allocation2 + $0x8] sm:$0xff] }
 0x116   :  { %v544_v6 = vld [vmem:[#allocation2 + $0x10] sm:$0xf] }
 0x117   :  { %1618 = vmatpush3.msk.msra.mxu1 %vm554_vm4, %v544_v6 }
 0x118   :  { %1619 = vmatprep.subr.mxu1 %v1700_v2 }
 0x119   :  { %1620 = vmatpush3.msra.mxu1 %v543_v9 }
 0x11a   :  { %1621 = vmatprep.subr.mxu1 %v1700_v2 }
 0x11b   :  { %1622 = vmatpush3.msra.mxu1 %v542_v11 }
 0x11c   :  { %1624 = vmatmul.mubr.msk.f32.vlgmr.msra.gmra.mxu1 %vm550_vm5, %v2211_v10  ;;  %1458 = vmatprep.subr.msk.mxu1 %vm733_vm6, %v1701_v22  ;;  %vm702_vm6 = vcmp.eq.s32.totalorder %v1828_v27, %v2204_v7 }
 0x11d   :  { %1459 = vmatpush1.msk.msra.mxu1 %vm732_vm7, %v1701_v22  ;;  %961 = vmatprep.mubr.f32.mxu1 %v1700_v2  ;;  %vm698_vm7 = vcmp.eq.s32.totalorder %v1843_v29, %v2200_v5 }
 0x11e   :  { %1460 = vmatprep.subr.msk.mxu1 %vm728_vm8, %v1701_v22  ;;  %vm697_vm8 = vcmp.eq.s32.totalorder %v1843_v29, %v2204_v7 }
 0x11f   :  { %1461 = vmatpush1.msk.msra.mxu1 %vm727_vm9, %v1701_v22  ;;  %vm693_vm9 = vcmp.eq.s32.totalorder %v1858_v31, %v2200_v5 }
 0x120   :  { %1462 = vmatprep.subr.msk.mxu1 %vm723_vm10, %v1701_v22  ;;  %vm692_vm10 = vcmp.eq.s32.totalorder %v1858_v31, %v2204_v7 }
 0x121   :  { %1463 = vmatpush1.msk.msra.mxu1 %vm722_vm11, %v1701_v22  ;;  %vm688_vm11 = vcmp.eq.s32.totalorder %v1873_v33, %v2200_v5 }
 0x122   :  { %1464 = vmatprep.subr.msk.mxu1 %vm718_vm12, %v1701_v22  ;;  %vm687_vm12 = vcmp.eq.s32.totalorder %v1873_v33, %v2204_v7 }
 0x123   :  { %1465 = vmatpush1.msk.msra.mxu1 %vm717_vm13, %v1701_v22  ;;  %vm683_vm13 = vcmp.eq.s32.totalorder %v1888_v35, %v2200_v5 }
 0x124   :  { %1466 = vmatprep.subr.msk.mxu1 %vm713_vm14, %v1701_v22  ;;  %vm682_vm14 = vcmp.eq.s32.totalorder %v1888_v35, %v2204_v7 }
 0x125   :  { %1467 = vmatpush1.msk.msra.mxu1 %vm712_vm15, %v1701_v22  ;;  %vm678_vm15 = vcmp.eq.s32.totalorder %v1903_v37, %v2200_v5 }
 0x126   :  { %1468 = vmatprep.subr.msk.mxu1 %vm708_vm0, %v1701_v22  ;;  %vm677_vm0 = vcmp.eq.s32.totalorder %v1903_v37, %v2204_v7 }
 0x127   :  { %1469 = vmatpush1.msk.msra.mxu1 %vm707_vm1, %v1701_v22  ;;  %vm673_vm1 = vcmp.eq.s32.totalorder %v1918_v39, %v2200_v5 }
 0x128   :  { %1470 = vmatprep.subr.msk.mxu1 %vm703_vm3, %v1701_v22  ;;  %vm672_vm3 = vcmp.eq.s32.totalorder %v1918_v39, %v2204_v7 }
 0x129   :  { %1471 = vmatpush1.msk.msra.mxu1 %vm702_vm6, %v1701_v22  ;;  %vm668_vm6 = vcmp.eq.s32.totalorder %v1933_v41, %v2200_v5 }
 0x12a   :  { %1472 = vmatprep.subr.msk.mxu1 %vm698_vm7, %v1701_v22  ;;  %vm667_vm7 = vcmp.eq.s32.totalorder %v1933_v41, %v2204_v7  ;;  %v1034_v17 = vpop.f32.mrf.mxu0 }
 0x12b   :  { %1473 = vmatpush1.msk.msra.mxu1 %vm697_vm8, %v1701_v22  ;;  %vm663_vm8 = vcmp.eq.s32.totalorder %v1947_v42, %v2200_v5 }
 0x12c   :  { %1474 = vmatprep.subr.msk.mxu1 %vm693_vm9, %v1701_v22  ;;  %vm662_vm9 = vcmp.eq.s32.totalorder %v1947_v42, %v2204_v7 }
 0x12d   :  { %1475 = vmatpush1.msk.msra.mxu1 %vm692_vm10, %v1701_v22  ;;  %vm658_vm10 = vcmp.eq.s32.totalorder %v1962_v43, %v2200_v5 }
 0x12e   :  { %1476 = vmatprep.subr.msk.mxu1 %vm688_vm11, %v1701_v22  ;;  %vm657_vm11 = vcmp.eq.s32.totalorder %v1962_v43, %v2204_v7 }
 0x12f   :  { %1477 = vmatpush1.msk.msra.mxu1 %vm687_vm12, %v1701_v22  ;;  %vm736_vm12 = vcmp.eq.s32.totalorder %v1752_v13, %v656_v14 }
 0x130   :  { %1478 = vmatprep.subr.msk.mxu1 %vm683_vm13, %v1701_v22  ;;  %vm731_vm13 = vcmp.eq.s32.totalorder %v1767_v18, %v656_v14 }
 0x131   :  { %1479 = vmatpush1.msk.msra.mxu1 %vm682_vm14, %v1701_v22  ;;  %vm726_vm14 = vcmp.eq.s32.totalorder %v1769_v19, %v656_v14  ;;  %v1036_v19 = vpop.f32.mrf.mxu0 }
 0x132   :  { %1480 = vmatprep.subr.msk.mxu1 %vm678_vm15, %v1701_v22  ;;  %vm721_vm15 = vcmp.eq.s32.totalorder %v1778_v21, %v656_v14 }
 0x133   :  { %1481 = vmatpush1.msk.msra.mxu1 %vm677_vm0, %v1701_v22  ;;  %vm716_vm0 = vcmp.eq.s32.totalorder %v1797_v24, %v656_v14 }
 0x134   :  { %1482 = vmatprep.subr.msk.mxu1 %vm673_vm1, %v1701_v22  ;;  %vm706_vm1 = vcmp.eq.s32.totalorder %v1828_v27, %v656_v14 }
 0x135   :  { %1483 = vmatpush1.msk.msra.mxu1 %vm672_vm3, %v1701_v22  ;;  %vm701_vm3 = vcmp.eq.s32.totalorder %v1843_v29, %v656_v14 }
 0x136   :  { %1484 = vmatprep.subr.msk.mxu1 %vm668_vm6, %v1701_v22  ;;  %vm696_vm6 = vcmp.eq.s32.totalorder %v1858_v31, %v656_v14 }
 0x137   :  { %1485 = vmatpush1.msk.msra.mxu1 %vm667_vm7, %v1701_v22  ;;  %vm691_vm7 = vcmp.eq.s32.totalorder %v1873_v33, %v656_v14 }
 0x138   :  { %1486 = vmatprep.subr.msk.mxu1 %vm663_vm8, %v1701_v22  ;;  %vm686_vm8 = vcmp.eq.s32.totalorder %v1888_v35, %v656_v14 }
 0x139   :  { %1487 = vmatpush1.msk.msra.mxu1 %vm662_vm9, %v1701_v22  ;;  %vm681_vm9 = vcmp.eq.s32.totalorder %v1903_v37, %v656_v14 }
 0x13a   :  { %1488 = vmatprep.subr.msk.mxu1 %vm658_vm10, %v1701_v22  ;;  %vm676_vm10 = vcmp.eq.s32.totalorder %v1918_v39, %v656_v14 }
 0x13b   :  { %1489 = vmatpush1.msk.msra.mxu1 %vm657_vm11, %v1701_v22  ;;  %vm671_vm11 = vcmp.eq.s32.totalorder %v1933_v41, %v656_v14 }
 0x13c   :  { %962 = vmatmul.mubr.f32.vlgmr.msra.gmra.mxu1 %v2189_v52  ;;  %1626 = vmatprep.subr.mxu1 %v1700_v2 }
 0x13d   :  { %1627 = vmatpush3.msk.msra.mxu1 %vm736_vm12, %v1701_v22  ;;  %1658 = vmatprep.mubr.msk.f32.mxu1 %vm1702_vm2, %v1700_v2  ;;  %vm711_vm2 = vcmp.eq.s32.totalorder %v1813_v25, %v656_v14  ;;  %vm666_vm12 = vcmp.eq.s32.totalorder %v1947_v42, %v656_v14 }
 0x13e   :  { %1628 = vmatprep.subr.mxu1 %v1700_v2 }
 0x13f   :  { %1629 = vmatpush3.msk.msra.mxu1 %vm731_vm13, %v1701_v22  ;;  %vm661_vm13 = vcmp.eq.s32.totalorder %v1962_v43, %v656_v14 }
 0x140   :  { %1630 = vmatprep.subr.mxu1 %v1700_v2 }
 0x141   :  { %1631 = vmatpush3.msk.msra.mxu1 %vm726_vm14, %v1701_v22 }
 0x142   :  { %1632 = vmatprep.subr.mxu1 %v1700_v2 }
 0x143   :  { %1633 = vmatpush3.msk.msra.mxu1 %vm721_vm15, %v1701_v22 }
 0x144   :  { %1634 = vmatprep.subr.mxu1 %v1700_v2 }
 0x145   :  { %1635 = vmatpush3.msk.msra.mxu1 %vm716_vm0, %v1701_v22 }
 0x146   :  { %1636 = vmatprep.subr.mxu1 %v1700_v2 }
 0x147   :  { %1637 = vmatpush3.msk.msra.mxu1 %vm711_vm2, %v1701_v22 }
 0x148   :  { %1638 = vmatprep.subr.mxu1 %v1700_v2 }
 0x149   :  { %1639 = vmatpush3.msk.msra.mxu1 %vm706_vm1, %v1701_v22 }
 0x14a   :  { %1640 = vmatprep.subr.mxu1 %v1700_v2 }
 0x14b   :  { %1641 = vmatpush3.msk.msra.mxu1 %vm701_vm3, %v1701_v22 }
 0x14c   :  { %1642 = vmatprep.subr.mxu1 %v1700_v2 }
 0x14d   :  { %1643 = vmatpush3.msk.msra.mxu1 %vm696_vm6, %v1701_v22 }
 0x14e   :  { %1644 = vmatprep.subr.mxu1 %v1700_v2 }
 0x14f   :  { %1645 = vmatpush3.msk.msra.mxu1 %vm691_vm7, %v1701_v22 }
 0x150   :  { %1646 = vmatprep.subr.mxu1 %v1700_v2 }
 0x151   :  { %1647 = vmatpush3.msk.msra.mxu1 %vm686_vm8, %v1701_v22 }
 0x152   :  { %1648 = vmatprep.subr.mxu1 %v1700_v2 }
 0x153   :  { %1649 = vmatpush3.msk.msra.mxu1 %vm681_vm9, %v1701_v22 }
 0x154   :  { %1650 = vmatprep.subr.mxu1 %v1700_v2 }
 0x155   :  { %1651 = vmatpush3.msk.msra.mxu1 %vm676_vm10, %v1701_v22 }
 0x156   :  { %1652 = vmatprep.subr.mxu1 %v1700_v2 }
 0x157   :  { %1653 = vmatpush3.msk.msra.mxu1 %vm671_vm11, %v1701_v22 }
 0x158   :  { %1654 = vmatprep.subr.mxu1 %v1700_v2 }
 0x159   :  { %1655 = vmatpush3.msk.msra.mxu1 %vm666_vm12, %v1701_v22 }
 0x15a   :  { %1656 = vmatprep.subr.mxu1 %v1700_v2 }
 0x15b   :  { %1657 = vmatpush3.msk.msra.mxu1 %vm661_vm13, %v1701_v22 }
 0x15c   :  { %1659 = vmatmul.mubr.f32.vlgmr.msra.gmra.mxu1 %v2189_v52 }
 0x1dc   :  { %v624_v13 = vpop.f32.mrf.mxu1 }
 0x1dd   :  { %v625_v15 = vadd.f32 %v624_v13, %v548_v8 }
 0x1de   :  { %v1625_v16 = vpop.f32.mrf.mxu1 }
 0x1df   :  { %628 = vst [vmem:[#allocation3] sm:$0xff] %v625_v15 }
 0x1fc   :  { %v963_v18 = vpop.f32.mrf.mxu1 }
 0x1fd   :  { %1109 = vst [vmem:[#allocation2] sm:$0xf] %v963_v18 }
 0x1fe   :  { %v965_v20 = vpop.f32.mrf.mxu1 }
 0x1ff   :  { %v1110_v21 = vadd.f32 %v1036_v19, %v965_v20  ;;  %v1114_v23 = vsub.f32 %v965_v20, %v1036_v19 }
 0x201   :  { %1111 = vst [vmem:[#allocation2 + $0x4] sm:$0xf] %v1110_v21  ;;  %v1115_v24 = vand.u32 2147483647, %v1114_v23 }
 0x203   :  { %1116 = vst [vmem:[#allocation2 + $0xc] sm:$0xf] %v1115_v24 }
 0x208   :  { %v1120_v31 = vld [vmem:[#allocation2] sm:$0xff] }
 0x21c   :  { %v1105_v25 = vpop.f32.mrf.mxu1 }
 0x21d   :  { %v1112_v26 = vadd.f32 %v1105_v25, %v1034_v17  ;;  %v1117_v22 = vsub.f32 %v1034_v17, %v1105_v25 }
 0x21e   :  { %v1660_v27 = vpop.f32.mrf.mxu1 }
 0x21f   :  { %1113 = vst [vmem:[#allocation2 + $0x8] sm:$0xf] %v1112_v26  ;;  %v1118_v28 = vand.u32 2147483647, %v1117_v22 }
 0x221   :  { %1119 = vst [vmem:[#allocation2 + $0x10] sm:$0xf] %v1118_v28 }
 0x226   :  { %v1121_v30 = vld [vmem:[#allocation2 + $0x8] sm:$0xff] }
 0x228   :  { %v1122_v29 = vld [vmem:[#allocation2 + $0x10] sm:$0xf] }
 0x229   :  { %1662 = vmatpush3.msk.msra.mxu0 %vm554_vm4, %v1122_v29 }
 0x22a   :  { %1663 = vmatprep.subr.mxu0 %v1700_v2 }
 0x22b   :  { %1664 = vmatpush3.msra.mxu0 %v1121_v30 }
 0x22c   :  { %1665 = vmatprep.subr.mxu0 %v1700_v2 }
 0x22d   :  { %1666 = vmatpush3.msra.mxu0 %v1120_v31 }
 0x22e   :  { %1668 = vmatmul.mubr.msk.f32.vlgmr.msra.gmra.mxu0 %vm550_vm5, %v2211_v10 }
 0x2ee   :  { %v1192_v32 = vpop.f32.mrf.mxu0 }
 0x2ef   :  { %v1193_v33 = vadd.f32 %v1192_v32, %v548_v8 }
 0x2f0   :  { %v1669_v34 = vpop.f32.mrf.mxu0 }
 0x2f1   :  { %1197 = vst [vmem:[#allocation3 + $0x8] sm:$0xff] %v1193_v33 }
 0x2f2   :  { %1689 = shalt.err (!%p1686_p4)
}
 0x2f3   :  { %s1705_s26 = smov 128   ;;  %s1706_s27 = smov 8  }
 0x2f4   :  { %1209 = dma.vmem_to_hbm [thread:$0]  %s1204_s24, 256, %s2379_s4, [#allocation4], %s1705_s26, %s1705_s26, %s1706_s27  }
 0x2f5   :  { %1698 = dma.done.wait [#allocation4], 256  }
 0x2f6   :  { %1699 = vsyncadd [#allocation4], 4294967040 }
 0x2f7   :  { %1213 = vsyncpa [#allocation4], 1 }

</bundles_post_ra>
